<compile_context>
chip_gen: v7x
topology: tpu7x:2x2x1
jax: 0.10.0
libtpu: 0.0.40
codegen_flags: <defaults>
</compile_context>

<pallas_src>
import jax
import jax.numpy as jnp
from jax.experimental import pallas as pl
from jax.experimental.pallas import tpu as pltpu

LANE = 128
SUBLANE = 8
# Tile sizing budget: stay well inside the smallest default scoped VMEM
# (32 MiB on v6e/v7x) even with double-buffered activations + weights.
_VMEM_TILE_BUDGET = 24 * 1024 * 1024
_VMEM_LIMIT_BYTES = 32 * 1024 * 1024
_MAX_TILE_B = 1024


def _round_up(x, m):
    return (x + m - 1) // m * m


def make_mlp_kernel(num_layers, compute_dtype):
    """Fused MLP kernel for `num_layers` Linear layers.

    Ref order: (x_ref, w0, b0, w1, b1, ..., w_{L-1}, b_{L-1}, o_ref).
    ReLU after every layer except the last.  Matmuls run in `compute_dtype`
    (f32 or bf16) with f32 accumulation; bias add + ReLU always in f32.
    """

    def kernel(*refs):
        x_ref = refs[0]
        o_ref = refs[-1]
        wb_refs = refs[1:-1]

        h = x_ref[...].astype(jnp.float32)
        for i in range(num_layers):
            w = wb_refs[2 * i][...]
            b = wb_refs[2 * i + 1][...].astype(jnp.float32)
            lhs = h.astype(compute_dtype)
            h = jnp.dot(lhs, w, preferred_element_type=jnp.float32) + b
            if i < num_layers - 1:
                h = jnp.maximum(h, 0.0)  # ReLU (f32 VPU path)
        o_ref[...] = h.astype(o_ref.dtype)

    return kernel


def _choose_tile_b(batch, d_in_pad, d_out_pad, max_width, weight_bytes):
    """Largest multiple-of-8 batch tile that fits the VMEM budget."""
    # double-buffered in/out blocks + ~2 live f32 activation tiles per row,
    # plus a bf16 copy of the activation fed to the MXU.
    per_row = 4 * (2 * d_in_pad + 2 * d_out_pad + 2 * max_width) + 2 * max_width
    avail = _VMEM_TILE_BUDGET - 2 * weight_bytes  # 2x: covers double-buffer fallback
    avail = max(avail, per_row * SUBLANE)
    tile = (avail // per_row) // SUBLANE * SUBLANE
    tile = max(SUBLANE, min(tile, _MAX_TILE_B))
    if batch >= 2 * SUBLANE:
        # keep the grid >= 2 steps so v7x megacore can split the batch.
        half = _round_up(-(-batch // 2), SUBLANE)
        tile = min(tile, half)
    tile = min(tile, _round_up(batch, SUBLANE))
    return max(SUBLANE, tile)


def _pad_params(params, weight_dtype):
    """Zero-pad every layer to lane-multiple widths; weights -> weight_dtype."""
    padded = []
    for w, b in params:
        din, dout = w.shape
        din_p = _round_up(din, LANE)
        dout_p = _round_up(dout, LANE)
        wp = jnp.zeros((din_p, dout_p), weight_dtype)
        wp = wp.at[:din, :dout].set(w.astype(weight_dtype))
        bp = jnp.zeros((1, dout_p), jnp.float32)
        bp = bp.at[:, :dout].set(b.astype(jnp.float32))
        padded.append((wp, bp))
    return padded


def scale_translate_forward(x, params, *, tile_b=None,
                            weight_dtype=jnp.float32):
    """ScaleTranslate MLP forward pass as a single fused Pallas kernel.

    x:      (B, data_dim) float32
    params: list of (W, b) with W: (in, out), b: (1, out)  [f32]
    """
    B, D = x.shape
    num_layers = len(params)
    d_out = params[-1][0].shape[1]

    padded_params = _pad_params(params, weight_dtype)
    d_in_pad = padded_params[0][0].shape[0]
    d_out_pad = padded_params[-1][0].shape[1]
    widths_pad = [d_in_pad] + [wp.shape[1] for wp, _ in padded_params]
    weight_bytes = sum(int(wp.nbytes) + int(bp.nbytes)
                       for wp, bp in padded_params)

    if tile_b is None:
        tile_b = _choose_tile_b(B, d_in_pad, d_out_pad, max(widths_pad),
                                weight_bytes)
    assert tile_b % SUBLANE == 0, "tile_b must be a multiple of 8"

    # Pad batch up to a tile multiple and the feature dim up to lanes.
    B_pad = _round_up(max(B, tile_b), tile_b)
    x_pad = jnp.zeros((B_pad, d_in_pad), x.dtype).at[:B, :D].set(x)
    grid = (B_pad // tile_b,)

    kernel = make_mlp_kernel(num_layers, weight_dtype)

    flat_params = []
    for wp, bp in padded_params:
        flat_params.extend([wp, bp])

    # Cost estimate: tiny kernel, let XLA schedule around it instead of
    # serializing on the custom call.
    flops = 2 * B_pad * sum(wp.shape[0] * wp.shape[1]
                            for wp, _ in padded_params)
    bytes_accessed = int(x_pad.nbytes) + B_pad * d_out_pad * 4 + weight_bytes
    cost = pl.CostEstimate(flops=int(flops), transcendentals=0,
                           bytes_accessed=int(bytes_accessed))

    out_shape = jax.ShapeDtypeStruct((B_pad, d_out_pad), x.dtype)
    out_spec = pl.BlockSpec((tile_b, d_out_pad), lambda i: (i, 0))
    compiler_params = pltpu.CompilerParams(
        dimension_semantics=("parallel",),
        vmem_limit_bytes=_VMEM_LIMIT_BYTES)

    def _run(single_buffer_weights):
        in_specs = [pl.BlockSpec((tile_b, d_in_pad), lambda i: (i, 0))]
        for wp, bp in padded_params:
            if single_buffer_weights:
                # Constant block index -> no need for double buffering;
                # halves resident weight footprint (matters on v7x 64 MiB VMEM).
                in_specs.append(pl.BlockSpec(wp.shape, lambda i: (0, 0),
                                             pipeline_mode=pl.Buffered(1)))
                in_specs.append(pl.BlockSpec(bp.shape, lambda i: (0, 0),
                                             pipeline_mode=pl.Buffered(1)))
            else:
                in_specs.append(pl.BlockSpec(wp.shape, lambda i: (0, 0)))
                in_specs.append(pl.BlockSpec(bp.shape, lambda i: (0, 0)))
        return pl.pallas_call(
            kernel,
            out_shape=out_shape,
            grid=grid,
            in_specs=in_specs,
            out_specs=out_spec,
            compiler_params=compiler_params,
            cost_estimate=cost,
        )(x_pad, *flat_params)

    try:
        out_pad = _run(single_buffer_weights=True)
    except Exception:
        # Fallback if this JAX build rejects pl.Buffered(1) weight specs.
        out_pad = _run(single_buffer_weights=False)

    return out_pad[:B, :d_out]


def init_scale_translate_params(key, data_dim, n_hidden, hidden_dims):
    """Match PyTorch nn.Linear shapes/init; weights stored as (in, out)."""
    dims = [data_dim] + [n_hidden] * hidden_dims + [data_dim]
    params = []
    for i in range(len(dims) - 1):
        fan_in, fan_out = dims[i], dims[i + 1]
        key, kw, kb = jax.random.split(key, 3)
        bound = 1.0 / jnp.sqrt(jnp.float32(fan_in))
        w = jax.random.uniform(kw, (fan_in, fan_out), jnp.float32,
                               minval=-bound, maxval=bound)
        b = jax.random.uniform(kb, (1, fan_out), jnp.float32,
                               minval=-bound, maxval=bound)
        params.append((w, b))
    return params


def reference_forward(x, params, weight_dtype=jnp.float32):
    """Pure-JAX reference of the same MLP (optionally bf16 matmul operands)."""
    h = x.astype(jnp.float32)
    n = len(params)
    for i, (w, b) in enumerate(params):
        h = jnp.dot(h.astype(weight_dtype), w.astype(weight_dtype),
                    preferred_element_type=jnp.float32) + b.astype(jnp.float32)
        if i < n - 1:
            h = jnp.maximum(h, 0.0)
    return h


if __name__ == "__main__":
    data_dim = 4
    n_hidden = 32
    hidden_dims = 2  # total Linear layers = hidden_dims + 1 = 3

    key = jax.random.PRNGKey(0)
    key, kp = jax.random.split(key)
    params = init_scale_translate_params(kp, data_dim, n_hidden, hidden_dims)

    # 1) Small batch, f32 weights, tight tolerance.
    key, kx1 = jax.random.split(key)
    x_small = jax.random.normal(kx1, (8, data_dim), jnp.float32)
    out = jax.block_until_ready(scale_translate_forward(x_small, params))
    ref = reference_forward(x_small, params)
    assert out.shape == x_small.shape
    assert jnp.allclose(out, ref, atol=1e-5, rtol=1e-5)

    # 2) Ragged batch (exercises batch padding + multi-step grid) with bf16
    #    MXU operands / f32 accumulation, looser tolerance.
    key, kx2 = jax.random.split(key)
    x_big = jax.random.normal(kx2, (50, data_dim), jnp.float32)
    out_bf16 = jax.block_until_ready(
        scale_translate_forward(x_big, params, weight_dtype=jnp.bfloat16))
    ref_bf16 = reference_forward(x_big, params, weight_dtype=jnp.bfloat16)
    assert out_bf16.shape == x_big.shape
    assert jnp.allclose(out_bf16, ref_bf16, atol=3e-2, rtol=3e-2)

    print("KERNEL_OK")
</pallas_src>

<mosaic_0001>
module attributes {stable_mosaic.version = 11 : i64} {
  func.func @kernel(%arg0: i32, %arg1: memref<8x128xf32, #tpu.memory_space<vmem>>, %arg2: memref<128x128xf32, #tpu.memory_space<vmem>>, %arg3: memref<1x128xf32, #tpu.memory_space<vmem>>, %arg4: memref<128x128xf32, #tpu.memory_space<vmem>>, %arg5: memref<1x128xf32, #tpu.memory_space<vmem>>, %arg6: memref<128x128xf32, #tpu.memory_space<vmem>>, %arg7: memref<1x128xf32, #tpu.memory_space<vmem>>, %arg8: memref<8x128xf32, #tpu.memory_space<vmem>>) attributes {dimension_semantics = [#tpu.dimension_semantics<parallel>], iteration_bounds = array<i64: 1>, scalar_prefetch = 0 : i64, scratch_operands = 0 : i64, tpu.core_type = #tpu.core_type<tc>, window_params = [{transform_indices = @transform_0, window_bounds = array<i64: 8, 128>}, {pipeline_mode = #tpu.pipeline_mode<synchronous>, transform_indices = @transform_1, window_bounds = array<i64: 128, 128>}, {pipeline_mode = #tpu.pipeline_mode<synchronous>, transform_indices = @transform_2, window_bounds = array<i64: 1, 128>}, {pipeline_mode = #tpu.pipeline_mode<synchronous>, transform_indices = @transform_3, window_bounds = array<i64: 128, 128>}, {pipeline_mode = #tpu.pipeline_mode<synchronous>, transform_indices = @transform_4, window_bounds = array<i64: 1, 128>}, {pipeline_mode = #tpu.pipeline_mode<synchronous>, transform_indices = @transform_5, window_bounds = array<i64: 128, 128>}, {pipeline_mode = #tpu.pipeline_mode<synchronous>, transform_indices = @transform_6, window_bounds = array<i64: 1, 128>}, {transform_indices = @transform_7, window_bounds = array<i64: 8, 128>}]} {
    %c0 = arith.constant 0 : index
    %c0_0 = arith.constant 0 : index
    %0 = vector.load %arg1[%c0, %c0_0] : memref<8x128xf32, #tpu.memory_space<vmem>>, vector<8x128xf32>
    %c0_1 = arith.constant 0 : index
    %c0_2 = arith.constant 0 : index
    %1 = vector.load %arg2[%c0_1, %c0_2] : memref<128x128xf32, #tpu.memory_space<vmem>>, vector<128x128xf32>
    %c0_3 = arith.constant 0 : index
    %c0_4 = arith.constant 0 : index
    %2 = vector.load %arg3[%c0_3, %c0_4] : memref<1x128xf32, #tpu.memory_space<vmem>>, vector<1x128xf32>
    %cst = arith.constant dense<0.000000e+00> : vector<8x128xf32>
    %3 = tpu.matmul %0, %1, %cst {dimension_numbers = #tpu.dot_dimension_numbers<[1], [0], [0], [1], [0, 0, 1, 1], [], []>} : vector<8x128xf32>, vector<128x128xf32>, vector<8x128xf32> -> vector<8x128xf32>
    %4 = vector.broadcast %2 : vector<1x128xf32> to vector<8x128xf32>
    %5 = arith.addf %3, %4 : vector<8x128xf32>
    %cst_5 = arith.constant 0.000000e+00 : f32
    %6 = vector.broadcast %cst_5 : f32 to vector<8x128xf32>
    %7 = arith.maximumf %5, %6 : vector<8x128xf32>
    %c0_6 = arith.constant 0 : index
    %c0_7 = arith.constant 0 : index
    %8 = vector.load %arg4[%c0_6, %c0_7] : memref<128x128xf32, #tpu.memory_space<vmem>>, vector<128x128xf32>
    %c0_8 = arith.constant 0 : index
    %c0_9 = arith.constant 0 : index
    %9 = vector.load %arg5[%c0_8, %c0_9] : memref<1x128xf32, #tpu.memory_space<vmem>>, vector<1x128xf32>
    %cst_10 = arith.constant dense<0.000000e+00> : vector<8x128xf32>
    %10 = tpu.matmul %7, %8, %cst_10 {dimension_numbers = #tpu.dot_dimension_numbers<[1], [0], [0], [1], [0, 0, 1, 1], [], []>} : vector<8x128xf32>, vector<128x128xf32>, vector<8x128xf32> -> vector<8x128xf32>
    %11 = vector.broadcast %9 : vector<1x128xf32> to vector<8x128xf32>
    %12 = arith.addf %10, %11 : vector<8x128xf32>
    %cst_11 = arith.constant 0.000000e+00 : f32
    %13 = vector.broadcast %cst_11 : f32 to vector<8x128xf32>
    %14 = arith.maximumf %12, %13 : vector<8x128xf32>
    %c0_12 = arith.constant 0 : index
    %c0_13 = arith.constant 0 : index
    %15 = vector.load %arg6[%c0_12, %c0_13] : memref<128x128xf32, #tpu.memory_space<vmem>>, vector<128x128xf32>
    %c0_14 = arith.constant 0 : index
    %c0_15 = arith.constant 0 : index
    %16 = vector.load %arg7[%c0_14, %c0_15] : memref<1x128xf32, #tpu.memory_space<vmem>>, vector<1x128xf32>
    %cst_16 = arith.constant dense<0.000000e+00> : vector<8x128xf32>
    %17 = tpu.matmul %14, %15, %cst_16 {dimension_numbers = #tpu.dot_dimension_numbers<[1], [0], [0], [1], [0, 0, 1, 1], [], []>} : vector<8x128xf32>, vector<128x128xf32>, vector<8x128xf32> -> vector<8x128xf32>
    %18 = vector.broadcast %16 : vector<1x128xf32> to vector<8x128xf32>
    %19 = arith.addf %17, %18 : vector<8x128xf32>
    %c0_17 = arith.constant 0 : index
    %c0_18 = arith.constant 0 : index
    %20 = vector.load %arg8[%c0_17, %c0_18] : memref<8x128xf32, #tpu.memory_space<vmem>>, vector<8x128xf32>
    tpu.vector_store %arg8[%c0_17, %c0_18], %19 {strides = array<i32>} : memref<8x128xf32, #tpu.memory_space<vmem>>, vector<8x128xf32>,
    return
  }
  func.func @transform_0(%arg0: i32) -> (i32, i32) {
    %c0_i32 = arith.constant 0 : i32
    %c0_i32_0 = arith.constant 0 : i32
    return %arg0, %c0_i32 : i32, i32
  }
  func.func @transform_1(%arg0: i32) -> (i32, i32) {
    %c0_i32 = arith.constant 0 : i32
    %c0_i32_0 = arith.constant 0 : i32
    %c0_i32_1 = arith.constant 0 : i32
    return %c0_i32, %c0_i32_0 : i32, i32
  }
  func.func @transform_2(%arg0: i32) -> (i32, i32) {
    %c0_i32 = arith.constant 0 : i32
    %c0_i32_0 = arith.constant 0 : i32
    %c0_i32_1 = arith.constant 0 : i32
    return %c0_i32, %c0_i32_0 : i32, i32
  }
  func.func @transform_3(%arg0: i32) -> (i32, i32) {
    %c0_i32 = arith.constant 0 : i32
    %c0_i32_0 = arith.constant 0 : i32
    %c0_i32_1 = arith.constant 0 : i32
    return %c0_i32, %c0_i32_0 : i32, i32
  }
  func.func @transform_4(%arg0: i32) -> (i32, i32) {
    %c0_i32 = arith.constant 0 : i32
    %c0_i32_0 = arith.constant 0 : i32
    %c0_i32_1 = arith.constant 0 : i32
    return %c0_i32, %c0_i32_0 : i32, i32
  }
  func.func @transform_5(%arg0: i32) -> (i32, i32) {
    %c0_i32 = arith.constant 0 : i32
    %c0_i32_0 = arith.constant 0 : i32
    %c0_i32_1 = arith.constant 0 : i32
    return %c0_i32, %c0_i32_0 : i32, i32
  }
  func.func @transform_6(%arg0: i32) -> (i32, i32) {
    %c0_i32 = arith.constant 0 : i32
    %c0_i32_0 = arith.constant 0 : i32
    %c0_i32_1 = arith.constant 0 : i32
    return %c0_i32, %c0_i32_0 : i32, i32
  }
  func.func @transform_7(%arg0: i32) -> (i32, i32) {
    %c0_i32 = arith.constant 0 : i32
    %c0_i32_0 = arith.constant 0 : i32
    return %arg0, %c0_i32 : i32, i32
  }
}

module attributes {stable_mosaic.version = 11 : i64} {
  func.func @kernel(%arg0: i32, %arg1: memref<8x128xf32, #tpu.memory_space<vmem>>, %arg2: memref<128x128xf32, #tpu.memory_space<vmem>>, %arg3: memref<1x128xf32, #tpu.memory_space<vmem>>, %arg4: memref<128x128xf32, #tpu.memory_space<vmem>>, %arg5: memref<1x128xf32, #tpu.memory_space<vmem>>, %arg6: memref<128x128xf32, #tpu.memory_space<vmem>>, %arg7: memref<1x128xf32, #tpu.memory_space<vmem>>, %arg8: memref<8x128xf32, #tpu.memory_space<vmem>>) attributes {dimension_semantics = [#tpu.dimension_semantics<parallel>], iteration_bounds = array<i64: 1>, scalar_prefetch = 0 : i64, scratch_operands = 0 : i64, tpu.core_type = #tpu.core_type<tc>, window_params = [{transform_indices = @transform_0, window_bounds = array<i64: 8, 128>}, {pipeline_mode = #tpu.pipeline_mode<synchronous>, transform_indices = @transform_1, window_bounds = array<i64: 128, 128>}, {pipeline_mode = #tpu.pipeline_mode<synchronous>, transform_indices = @transform_2, window_bounds = array<i64: 1, 128>}, {pipeline_mode = #tpu.pipeline_mode<synchronous>, transform_indices = @transform_3, window_bounds = array<i64: 128, 128>}, {pipeline_mode = #tpu.pipeline_mode<synchronous>, transform_indices = @transform_4, window_bounds = array<i64: 1, 128>}, {pipeline_mode = #tpu.pipeline_mode<synchronous>, transform_indices = @transform_5, window_bounds = array<i64: 128, 128>}, {pipeline_mode = #tpu.pipeline_mode<synchronous>, transform_indices = @transform_6, window_bounds = array<i64: 1, 128>}, {transform_indices = @transform_7, window_bounds = array<i64: 8, 128>}]} {
    %c0 = arith.constant 0 : index
    %c0_0 = arith.constant 0 : index
    %0 = vector.load %arg1[%c0, %c0_0] : memref<8x128xf32, #tpu.memory_space<vmem>>, vector<8x128xf32>
    %c0_1 = arith.constant 0 : index
    %c0_2 = arith.constant 0 : index
    %1 = vector.load %arg2[%c0_1, %c0_2] : memref<128x128xf32, #tpu.memory_space<vmem>>, vector<128x128xf32>
    %c0_3 = arith.constant 0 : index
    %c0_4 = arith.constant 0 : index
    %2 = vector.load %arg3[%c0_3, %c0_4] : memref<1x128xf32, #tpu.memory_space<vmem>>, vector<1x128xf32>
    %cst = arith.constant dense<0.000000e+00> : vector<8x128xf32>
    %3 = tpu.matmul %0, %1, %cst {dimension_numbers = #tpu.dot_dimension_numbers<[1], [0], [0], [1], [0, 0, 1, 1], [], []>} : vector<8x128xf32>, vector<128x128xf32>, vector<8x128xf32> -> vector<8x128xf32>
    %4 = vector.broadcast %2 : vector<1x128xf32> to vector<8x128xf32>
    %5 = arith.addf %3, %4 : vector<8x128xf32>
    %cst_5 = arith.constant 0.000000e+00 : f32
    %6 = vector.broadcast %cst_5 : f32 to vector<8x128xf32>
    %7 = arith.maximumf %5, %6 : vector<8x128xf32>
    %c0_6 = arith.constant 0 : index
    %c0_7 = arith.constant 0 : index
    %8 = vector.load %arg4[%c0_6, %c0_7] : memref<128x128xf32, #tpu.memory_space<vmem>>, vector<128x128xf32>
    %c0_8 = arith.constant 0 : index
    %c0_9 = arith.constant 0 : index
    %9 = vector.load %arg5[%c0_8, %c0_9] : memref<1x128xf32, #tpu.memory_space<vmem>>, vector<1x128xf32>
    %cst_10 = arith.constant dense<0.000000e+00> : vector<8x128xf32>
    %10 = tpu.matmul %7, %8, %cst_10 {dimension_numbers = #tpu.dot_dimension_numbers<[1], [0], [0], [1], [0, 0, 1, 1], [], []>} : vector<8x128xf32>, vector<128x128xf32>, vector<8x128xf32> -> vector<8x128xf32>
    %11 = vector.broadcast %9 : vector<1x128xf32> to vector<8x128xf32>
    %12 = arith.addf %10, %11 : vector<8x128xf32>
    %cst_11 = arith.constant 0.000000e+00 : f32
    %13 = vector.broadcast %cst_11 : f32 to vector<8x128xf32>
    %14 = arith.maximumf %12, %13 : vector<8x128xf32>
    %c0_12 = arith.constant 0 : index
    %c0_13 = arith.constant 0 : index
    %15 = vector.load %arg6[%c0_12, %c0_13] : memref<128x128xf32, #tpu.memory_space<vmem>>, vector<128x128xf32>
    %c0_14 = arith.constant 0 : index
    %c0_15 = arith.constant 0 : index
    %16 = vector.load %arg7[%c0_14, %c0_15] : memref<1x128xf32, #tpu.memory_space<vmem>>, vector<1x128xf32>
    %cst_16 = arith.constant dense<0.000000e+00> : vector<8x128xf32>
    %17 = tpu.matmul %14, %15, %cst_16 {dimension_numbers = #tpu.dot_dimension_numbers<[1], [0], [0], [1], [0, 0, 1, 1], [], []>} : vector<8x128xf32>, vector<128x128xf32>, vector<8x128xf32> -> vector<8x128xf32>
    %18 = vector.broadcast %16 : vector<1x128xf32> to vector<8x128xf32>
    %19 = arith.addf %17, %18 : vector<8x128xf32>
    %c0_17 = arith.constant 0 : index
    %c0_18 = arith.constant 0 : index
    %20 = vector.load %arg8[%c0_17, %c0_18] : memref<8x128xf32, #tpu.memory_space<vmem>>, vector<8x128xf32>
    tpu.vector_store %arg8[%c0_17, %c0_18], %19 {strides = array<i32>} : memref<8x128xf32, #tpu.memory_space<vmem>>, vector<8x128xf32>,
    return
  }
  func.func @transform_0(%arg0: i32) -> (i32, i32) {
    %c0_i32 = arith.constant 0 : i32
    %c0_i32_0 = arith.constant 0 : i32
    return %arg0, %c0_i32 : i32, i32
  }
  func.func @transform_1(%arg0: i32) -> (i32, i32) {
    %c0_i32 = arith.constant 0 : i32
    %c0_i32_0 = arith.constant 0 : i32
    %c0_i32_1 = arith.constant 0 : i32
    return %c0_i32, %c0_i32_0 : i32, i32
  }
  func.func @transform_2(%arg0: i32) -> (i32, i32) {
    %c0_i32 = arith.constant 0 : i32
    %c0_i32_0 = arith.constant 0 : i32
    %c0_i32_1 = arith.constant 0 : i32
    return %c0_i32, %c0_i32_0 : i32, i32
  }
  func.func @transform_3(%arg0: i32) -> (i32, i32) {
    %c0_i32 = arith.constant 0 : i32
    %c0_i32_0 = arith.constant 0 : i32
    %c0_i32_1 = arith.constant 0 : i32
    return %c0_i32, %c0_i32_0 : i32, i32
  }
  func.func @transform_4(%arg0: i32) -> (i32, i32) {
    %c0_i32 = arith.constant 0 : i32
    %c0_i32_0 = arith.constant 0 : i32
    %c0_i32_1 = arith.constant 0 : i32
    return %c0_i32, %c0_i32_0 : i32, i32
  }
  func.func @transform_5(%arg0: i32) -> (i32, i32) {
    %c0_i32 = arith.constant 0 : i32
    %c0_i32_0 = arith.constant 0 : i32
    %c0_i32_1 = arith.constant 0 : i32
    return %c0_i32, %c0_i32_0 : i32, i32
  }
  func.func @transform_6(%arg0: i32) -> (i32, i32) {
    %c0_i32 = arith.constant 0 : i32
    %c0_i32_0 = arith.constant 0 : i32
    %c0_i32_1 = arith.constant 0 : i32
    return %c0_i32, %c0_i32_0 : i32, i32
  }
  func.func @transform_7(%arg0: i32) -> (i32, i32) {
    %c0_i32 = arith.constant 0 : i32
    %c0_i32_0 = arith.constant 0 : i32
    return %arg0, %c0_i32 : i32, i32
  }
}

</mosaic_0001>

<bundles_post_ra>
// kernel: tpu_custom_call.1
= control target key start
LH: loop header
LB: loop body
LE: loop exit
PB: predicated region body
PF: predicated region fallthrough
CT: control target
= control target key end

     0   :  { %12 = vsyncpa [#allocation3], 0  ;;  %s897_s0 = inlined_call_operand.hbm [shape: f32[8,128], index: 0, kind: input, shape index: {}]   ;;  %s898_s1 = inlined_call_operand.hbm [shape: f32[128,128], index: 1, kind: input, shape index: {}]   ;;  %s899_s2 = inlined_call_operand.vmem [shape: f32[1,128], index: 2, kind: input, shape index: {}]   ;;  %s900_s3 = inlined_call_operand.hbm [shape: f32[128,128], index: 3, kind: input, shape index: {}]   ;;  %s901_s4 = inlined_call_operand.vmem [shape: f32[1,128], index: 4, kind: input, shape index: {}]   ;;  %s902_s5 = inlined_call_operand.hbm [shape: f32[128,128], index: 5, kind: input, shape index: {}]   ;;  %s903_s6 = inlined_call_operand.vmem [shape: f32[1,128], index: 6, kind: input, shape index: {}]   ;;  %s904_s7 = inlined_call_operand.hbm [shape: f32[8,128], index: 7, kind: output, shape index: {}]  }
   0x1   :  { %13 = vsyncpa [#allocation6], 0 }
   0x2   :  { %14 = vsyncpa [#allocation9], 0 }
   0x3   :  { %15 = vsyncpa [#allocation4], 0  ;;  %s739_s24 = smov [#allocation5]   ;;  %s621_s28 = scalar_lea.hbm %s898_s1, 2048 }
   0x4   :  { %s31_s25 = sshll.u32 %s739_s24, 4  ;;  %p622_p0 = scmp.ne.s32.totalorder %s898_s1, %s621_s28  ;;  %s32_s25 = int_to_ptr.vmem [resolvable:$true] %s31_s25 }
   0x5   :  { %p625_p1 = scmp.lt.u32.totalorder %s621_s28, %s898_s1 }
   0x7   :  { %p627_p2 = pnand %p625_p1, %p622_p0 }
   0x9   :  { %630 = shalt.err (!%p627_p2)
}
   0xa   :  { %s631_s10 = scalar_lea.vmem %s32_s25, 2048  ;;  %p636_p4 = scmp.lt.s32.totalorder %s32_s25, %s32_s25 }
   0xb   :  { %p632_p3 = scmp.ne.s32.totalorder %s32_s25, %s631_s10  ;;  %p637_p5 = scmp.lt.s32.totalorder %s631_s10, %s631_s10 }
   0xd   :  { %p638_p6 = por %p637_p5, %p636_p4 }
   0xf   :  { %p639_p7 = pnand %p638_p6, %p632_p3 }
  0x11   :  { %642 = shalt.err (!%p639_p7)
}
  0x12   :  { %s740_s11 = smov 128   ;;  %s741_s12 = smov 8  }
  0x13   :  { %37 = dma.hbm_to_vmem [thread:$0]  %s898_s1, 2048, %s32_s25, [#allocation6], %s740_s11, %s740_s11, %s741_s12  }
  0x14   :  { %s742_s15 = smov [#allocation2]   ;;  %s743_s17 = smov [#allocation7]  }
  0x15   :  { %s22_s16 = sshll.u32 %s742_s15, 4  ;;  %s45_s18 = sshll.u32 %s743_s17, 4  ;;  %s23_s16 = int_to_ptr.vmem [resolvable:$true] %s22_s16  ;;  %s46_s18 = int_to_ptr.vmem [resolvable:$true] %s45_s18 }
  0x16   :  { %s643_s21 = scalar_lea.hbm %s897_s0, 128 }
  0x17   :  { %p644_p8 = scmp.ne.s32.totalorder %s897_s0, %s643_s21  ;;  %p647_p9 = scmp.lt.u32.totalorder %s643_s21, %s897_s0 }
  0x19   :  { %p649_p10 = pnand %p647_p9, %p644_p8 }
  0x1b   :  { %652 = shalt.err (!%p649_p10)
}
  0x1c   :  { %s653_s1 = scalar_lea.vmem %s23_s16, 128  ;;  %p658_p12 = scmp.lt.s32.totalorder %s23_s16, %s23_s16 }
  0x1d   :  { %p654_p11 = scmp.ne.s32.totalorder %s23_s16, %s653_s1  ;;  %p659_p13 = scmp.lt.s32.totalorder %s653_s1, %s653_s1 }
  0x1f   :  { %p660_p0 = por %p659_p13, %p658_p12 }
  0x21   :  { %p661_p1 = pnand %p660_p0, %p654_p11 }
  0x23   :  { %664 = shalt.err (!%p661_p1)
}
  0x24   :  { %25 = dma.hbm_to_vmem [thread:$0]  %s897_s0, 128, %s23_s16, [#allocation3]  }
  0x25   :  { %s665_s30 = scalar_lea.hbm %s900_s3, 2048 }
  0x26   :  { %p666_p2 = scmp.ne.s32.totalorder %s900_s3, %s665_s30  ;;  %p669_p3 = scmp.lt.u32.totalorder %s665_s30, %s900_s3 }
  0x28   :  { %p671_p4 = pnand %p669_p3, %p666_p2 }
  0x2a   :  { %674 = shalt.err (!%p671_p4)
}
  0x2b   :  { %s675_s14 = scalar_lea.vmem %s46_s18, 2048  ;;  %p680_p6 = scmp.lt.s32.totalorder %s46_s18, %s46_s18 }
  0x2c   :  { %p676_p5 = scmp.ne.s32.totalorder %s46_s18, %s675_s14  ;;  %p681_p7 = scmp.lt.s32.totalorder %s675_s14, %s675_s14 }
  0x2e   :  { %p682_p8 = por %p681_p7, %p680_p6 }
  0x30   :  { %p683_p9 = pnand %p682_p8, %p676_p5 }
  0x32   :  { %686 = shalt.err (!%p683_p9)
}
  0x33   :  { %51 = dma.hbm_to_vmem [thread:$0]  %s900_s3, 2048, %s46_s18, [#allocation6], %s740_s11, %s740_s11, %s741_s12  }
  0x34   :  { %s744_s16 = smov [#allocation8]   ;;  %s687_s21 = scalar_lea.hbm %s902_s5, 2048 }
  0x35   :  { %s59_s17 = sshll.u32 %s744_s16, 4  ;;  %p688_p10 = scmp.ne.s32.totalorder %s902_s5, %s687_s21  ;;  %s60_s17 = int_to_ptr.vmem [resolvable:$true] %s59_s17 }
  0x36   :  { %p691_p11 = scmp.lt.u32.totalorder %s687_s21, %s902_s5 }
  0x38   :  { %p693_p12 = pnand %p691_p11, %p688_p10 }
  0x3a   :  { %696 = shalt.err (!%p693_p12)
}
  0x3b   :  { %s697_s1 = scalar_lea.vmem %s60_s17, 2048  ;;  %p702_p0 = scmp.lt.s32.totalorder %s60_s17, %s60_s17 }
  0x3c   :  { %p698_p13 = scmp.ne.s32.totalorder %s60_s17, %s697_s1  ;;  %p703_p1 = scmp.lt.s32.totalorder %s697_s1, %s697_s1 }
  0x3e   :  { %p704_p2 = por %p703_p1, %p702_p0 }
  0x40   :  { %p705_p3 = pnand %p704_p2, %p698_p13 }
  0x42   :  { %708 = shalt.err (!%p705_p3)
}
  0x43   :  { %65 = dma.hbm_to_vmem [thread:$0]  %s902_s5, 2048, %s60_s17, [#allocation9], %s740_s11, %s740_s11, %s741_s12  }
  0x44   :  { %731 = dma.done.wait [#allocation3], 128  }
  0x45   :  { %732 = vsyncadd [#allocation3], 4294967168 }
  0x46   :  { %733 = dma.done.wait [#allocation6], 4096  }
  0x47   :  { %734 = vsyncadd [#allocation6], 4294963200 }
  0x48   :  { %735 = dma.done.wait [#allocation9], 2048  }
  0x49   :  { %736 = vsyncadd [#allocation9], 4294965248  ;;  %v745_v0 = vmov 0.0|0.0   ;;  %vm746_vm0 = vmmov 0   ;;  %v747_v1 = vmov 0.0   ;;  %v81_v2 = vld [vmem:[#allocation5] sm:$0xff] }
  0x4a   :  { %539 = vmatprep.subr.bf16.mxu0 %v745_v0  ;;  %466 = vmatprep.mubr.msk.f32.mxu0 %vm746_vm0, %v747_v1  ;;  %v82_v3 = vld [vmem:[#allocation5 + $0x8] sm:$0xff]  ;;  %v83_v4 = vld [vmem:[#allocation5 + $0x10] sm:$0xff]  ;;  %v84_v6 = vld [vmem:[#allocation5 + $0x18] sm:$0xff]  ;;  %s748_s28 = smov [#allocation10]  }
  0x4b   :  { %563 = vmatprep.subr.bf16.mxu1 %v745_v0  ;;  %501 = vmatprep.mubr.msk.f32.mxu1 %vm746_vm0, %v747_v1  ;;  %v540_v5 = vpack.c.bf16 %v82_v3, %v81_v2  ;;  %v543_v7 = vpack.c.bf16 %v84_v6, %v83_v4  ;;  %v85_v8 = vld [vmem:[#allocation5 + $0x20] sm:$0xff]  ;;  %v86_v9 = vld [vmem:[#allocation5 + $0x28] sm:$0xff]  ;;  %v177_v12 = vld [vmem:[#allocation7 + $0x10] sm:$0xff]  ;;  %s369_s29 = sshll.u32 %s748_s28, 4  ;;  %s370_s29 = int_to_ptr.vmem [resolvable:$true] %s369_s29 }
  0x4c   :  { %v175_v10 = vld [vmem:[#allocation7] sm:$0xff]  ;;  %v176_v11 = vld [vmem:[#allocation7 + $0x8] sm:$0xff]  ;;  %v178_v13 = vld [vmem:[#allocation7 + $0x18] sm:$0xff]  ;;  %v546_v14 = vpack.c.bf16 %v86_v9, %v85_v8  ;;  %s709_s30 = scalar_lea.vmem %s370_s29, 128  ;;  %p714_p5 = scmp.lt.s32.totalorder %s370_s29, %s370_s29 }
  0x4d   :  { %541 = vmatpush3.bf16.msra.mxu0 %v540_v5  ;;  %v564_v15 = vpack.c.bf16 %v176_v11, %v175_v10  ;;  %v87_v16 = vld [vmem:[#allocation5 + $0x30] sm:$0xff]  ;;  %v88_v17 = vld [vmem:[#allocation5 + $0x38] sm:$0xff]  ;;  %v567_v18 = vpack.c.bf16 %v178_v13, %v177_v12  ;;  %v179_v19 = vld [vmem:[#allocation7 + $0x20] sm:$0xff]  ;;  %p710_p4 = scmp.ne.s32.totalorder %s370_s29, %s709_s30  ;;  %p715_p6 = scmp.lt.s32.totalorder %s709_s30, %s709_s30 }
  0x4e   :  { %542 = vmatprep.subr.bf16.mxu0 %v745_v0  ;;  %v180_v20 = vld [vmem:[#allocation7 + $0x28] sm:$0xff]  ;;  %v549_v21 = vpack.c.bf16 %v88_v17, %v87_v16  ;;  %v89_v22 = vld [vmem:[#allocation5 + $0x40] sm:$0xff]  ;;  %v181_v25 = vld [vmem:[#allocation7 + $0x30] sm:$0xff] }
  0x4f   :  { %565 = vmatpush3.bf16.msra.mxu1 %v564_v15  ;;  %v90_v23 = vld [vmem:[#allocation5 + $0x48] sm:$0xff]  ;;  %v570_v24 = vpack.c.bf16 %v180_v20, %v179_v19  ;;  %v182_v26 = vld [vmem:[#allocation7 + $0x38] sm:$0xff]  ;;  %v91_v28 = vld [vmem:[#allocation5 + $0x50] sm:$0xff]  ;;  %p716_p7 = por %p715_p6, %p714_p5 }
  0x50   :  { %566 = vmatprep.subr.bf16.mxu1 %v745_v0  ;;  %v552_v27 = vpack.c.bf16 %v90_v23, %v89_v22  ;;  %v92_v29 = vld [vmem:[#allocation5 + $0x58] sm:$0xff]  ;;  %v573_v30 = vpack.c.bf16 %v182_v26, %v181_v25  ;;  %v183_v31 = vld [vmem:[#allocation7 + $0x40] sm:$0xff]  ;;  %v184_v32 = vld [vmem:[#allocation7 + $0x48] sm:$0xff] }
  0x51   :  { %544 = vmatpush3.bf16.msra.mxu0 %v543_v7  ;;  %v555_v33 = vpack.c.bf16 %v92_v29, %v91_v28  ;;  %v93_v34 = vld [vmem:[#allocation5 + $0x60] sm:$0xff]  ;;  %v94_v35 = vld [vmem:[#allocation5 + $0x68] sm:$0xff]  ;;  %v576_v36 = vpack.c.bf16 %v184_v32, %v183_v31  ;;  %v185_v37 = vld [vmem:[#allocation7 + $0x50] sm:$0xff]  ;;  %p717_p8 = pnand %p716_p7, %p710_p4 }
  0x52   :  { %545 = vmatprep.subr.bf16.mxu0 %v745_v0  ;;  %v186_v38 = vld [vmem:[#allocation7 + $0x58] sm:$0xff]  ;;  %v558_v39 = vpack.c.bf16 %v94_v35, %v93_v34  ;;  %v95_v40 = vld [vmem:[#allocation5 + $0x70] sm:$0xff]  ;;  %v187_v43 = vld [vmem:[#allocation7 + $0x60] sm:$0xff] }
  0x53   :  { %568 = vmatpush3.bf16.msra.mxu1 %v567_v18  ;;  %v96_v41 = vld [vmem:[#allocation5 + $0x78] sm:$0xff]  ;;  %v579_v42 = vpack.c.bf16 %v186_v38, %v185_v37  ;;  %v188_v44 = vld [vmem:[#allocation7 + $0x68] sm:$0xff]  ;;  %v189_v48 = vld [vmem:[#allocation7 + $0x70] sm:$0xff] }
  0x54   :  { %569 = vmatprep.subr.bf16.mxu1 %v745_v0  ;;  %v561_v45 = vpack.c.bf16 %v96_v41, %v95_v40  ;;  %v582_v46 = vpack.c.bf16 %v188_v44, %v187_v43  ;;  %v80_v47 = vld [vmem:[#allocation2] sm:$0xff]  ;;  %v269_v51 = vld [vmem:[#allocation8] sm:$0xff]  ;;  %v270_v52 = vld [vmem:[#allocation8 + $0x8] sm:$0xff] }
  0x55   :  { %547 = vmatpush3.bf16.msra.mxu0 %v546_v14  ;;  %v190_v49 = vld [vmem:[#allocation7 + $0x78] sm:$0xff]  ;;  %v271_v53 = vld [vmem:[#allocation8 + $0x10] sm:$0xff]  ;;  %v588_v54 = vpack.c.bf16 %v270_v52, %v269_v51  ;;  %v273_v57 = vld [vmem:[#allocation8 + $0x20] sm:$0xff] }
  0x56   :  { %548 = vmatprep.subr.bf16.mxu0 %v745_v0  ;;  %v585_v50 = vpack.c.bf16 %v190_v49, %v189_v48  ;;  %v272_v55 = vld [vmem:[#allocation8 + $0x18] sm:$0xff]  ;;  %v274_v58 = vld [vmem:[#allocation8 + $0x28] sm:$0xff]  ;;  %v275_v60 = vld [vmem:[#allocation8 + $0x30] sm:$0xff] }
  0x57   :  { %571 = vmatpush3.bf16.msra.mxu1 %v570_v24  ;;  %v591_v56 = vpack.c.bf16 %v272_v55, %v271_v53  ;;  %v594_v59 = vpack.c.bf16 %v274_v58, %v273_v57  ;;  %v276_v61 = vld [vmem:[#allocation8 + $0x38] sm:$0xff]  ;;  %v277_v63 = vld [vmem:[#allocation8 + $0x40] sm:$0xff]  ;;  %v279_v3 = vld [vmem:[#allocation8 + $0x50] sm:$0xff] }
  0x58   :  { %572 = vmatprep.subr.bf16.mxu1 %v745_v0  ;;  %v597_v62 = vpack.c.bf16 %v276_v61, %v275_v60  ;;  %v280_v4 = vld [vmem:[#allocation8 + $0x58] sm:$0xff]  ;;  %v281_v6 = vld [vmem:[#allocation8 + $0x60] sm:$0xff]  ;;  %v282_v7 = vld [vmem:[#allocation8 + $0x68] sm:$0xff] }
  0x59   :  { %550 = vmatpush3.bf16.msra.mxu0 %v549_v21  ;;  %v603_v5 = vpack.c.bf16 %v280_v4, %v279_v3  ;;  %v606_v8 = vpack.c.bf16 %v282_v7, %v281_v6  ;;  %v380_v9 = vld [vmem:[%s899_s2] ss:$0 sm:$0xff]  ;;  %v283_v14 = vld [vmem:[#allocation8 + $0x70] sm:$0xff] }
  0x5a   :  { %551 = vmatprep.subr.bf16.mxu0 %v745_v0  ;;  %v284_v15 = vld [vmem:[#allocation8 + $0x78] sm:$0xff] }
  0x5b   :  { %574 = vmatpush3.bf16.msra.mxu1 %v573_v30  ;;  %v609_v16 = vpack.c.bf16 %v284_v15, %v283_v14  ;;  %v381_v17 = vld [vmem:[%s901_s4] ss:$0 sm:$0xff] }
  0x5c   :  { %575 = vmatprep.subr.bf16.mxu1 %v745_v0  ;;  %v382_v21 = vld [vmem:[%s903_s6] ss:$0 sm:$0xff] }
  0x5d   :  { %553 = vmatpush3.bf16.msra.mxu0 %v552_v27 }
  0x5e   :  { %554 = vmatprep.subr.bf16.mxu0 %v745_v0 }
  0x5f   :  { %577 = vmatpush3.bf16.msra.mxu1 %v576_v36 }
  0x60   :  { %578 = vmatprep.subr.bf16.mxu1 %v745_v0 }
  0x61   :  { %556 = vmatpush3.bf16.msra.mxu0 %v555_v33 }
  0x62   :  { %557 = vmatprep.subr.bf16.mxu0 %v745_v0 }
  0x63   :  { %580 = vmatpush3.bf16.msra.mxu1 %v579_v42 }
  0x64   :  { %581 = vmatprep.subr.bf16.mxu1 %v745_v0 }
  0x65   :  { %559 = vmatpush3.bf16.msra.mxu0 %v558_v39 }
  0x66   :  { %560 = vmatprep.subr.bf16.mxu0 %v745_v0 }
  0x67   :  { %583 = vmatpush3.bf16.msra.mxu1 %v582_v46 }
  0x68   :  { %584 = vmatprep.subr.bf16.mxu1 %v745_v0 }
  0x69   :  { %562 = vmatpush3.bf16.msra.mxu0 %v561_v45 }
  0x6a   :  { %587 = vmatprep.subr.bf16.mxu0 %v745_v0 }
  0x6b   :  { %586 = vmatpush3.bf16.msra.mxu1 %v585_v50 }
  0x6c   :  { %467 = vmatmul.mubr.f32.vlgmr.msra.gmra.mrb[0].mxu0 %v80_v47 }
  0x6d   :  { %536 = vmatprep.mubr.msk.f32.mxu0 %vm746_vm0, %v747_v1  ;;  %589 = vmatpush3.bf16.msra.mxu0 %v588_v54  ;;  %v278_v1 = vld [vmem:[#allocation8 + $0x48] sm:$0xff] }
  0x6e   :  { %590 = vmatprep.subr.bf16.mxu0 %v745_v0  ;;  %v600_v2 = vpack.c.bf16 %v278_v1, %v277_v63 }
  0x71   :  { %592 = vmatpush3.bf16.msra.mxu0 %v591_v56 }
  0x72   :  { %593 = vmatprep.subr.bf16.mxu0 %v745_v0 }
  0x75   :  { %595 = vmatpush3.bf16.msra.mxu0 %v594_v59 }
  0x76   :  { %596 = vmatprep.subr.bf16.mxu0 %v745_v0 }
  0x79   :  { %598 = vmatpush3.bf16.msra.mxu0 %v597_v62 }
  0x7a   :  { %599 = vmatprep.subr.bf16.mxu0 %v745_v0 }
  0x7d   :  { %601 = vmatpush3.bf16.msra.mxu0 %v600_v2 }
  0x7e   :  { %602 = vmatprep.subr.bf16.mxu0 %v745_v0 }
  0x81   :  { %604 = vmatpush3.bf16.msra.mxu0 %v603_v5 }
  0x82   :  { %605 = vmatprep.subr.bf16.mxu0 %v745_v0 }
  0x85   :  { %607 = vmatpush3.bf16.msra.mxu0 %v606_v8 }
  0x86   :  { %608 = vmatprep.subr.bf16.mxu0 %v745_v0 }
  0x89   :  { %610 = vmatpush3.bf16.msra.mxu0 %v609_v16 }
 0x13f   :  { %v170_v10 = vpop.f32.mrb[0].mxu0 }
 0x140   :  { %v171_v11 = vadd.f32 %v380_v9, %v170_v10  ;;  %v468_v12 = vpop.f32.mrb[1].mxu0 }
 0x142   :  { %v174_v13 = vmax.f32 %v171_v11, 0.0 }
 0x144   :  { %502 = vmatmul.mubr.f32.vlgmr.msra.gmra.mrb[0].mxu1 %v174_v13 }
 0x217   :  { %v264_v18 = vpop.f32.mrb[0].mxu1 }
 0x218   :  { %v265_v19 = vadd.f32 %v381_v17, %v264_v18  ;;  %v503_v0 = vpop.f32.mrb[1].mxu1 }
 0x21a   :  { %v268_v20 = vmax.f32 %v265_v19, 0.0 }
 0x21c   :  { %537 = vmatmul.mubr.f32.vlgmr.msra.gmra.mrb[2].mxu0 %v268_v20 }
 0x2ef   :  { %v358_v22 = vpop.f32.mrb[2].mxu0 }
 0x2f0   :  { %v359_v23 = vadd.f32 %v382_v21, %v358_v22  ;;  %v538_v24 = vpop.f32.mrb[3].mxu0 }
 0x2f2   :  { %362 = vst [vmem:[#allocation10] sm:$0xff] %v359_v23 }
 0x2f3   :  { %720 = shalt.err (!%p717_p8)
}
 0x2f4   :  { %s721_s9 = scalar_lea.hbm %s904_s7, 128 }
 0x2f5   :  { %p722_p9 = scmp.ne.s32.totalorder %s904_s7, %s721_s9  ;;  %p725_p10 = scmp.lt.u32.totalorder %s721_s9, %s904_s7 }
 0x2f7   :  { %p727_p11 = pnand %p725_p10, %p722_p9 }
 0x2f9   :  { %730 = shalt.err (!%p727_p11)
}
 0x2fa   :  { %372 = dma.vmem_to_hbm [thread:$0]  %s370_s29, 128, %s904_s7, [#allocation4]  }
 0x2fb   :  { %737 = dma.done.wait [#allocation4], 128  }
 0x2fc   :  { %738 = vsyncadd [#allocation4], 4294967168 }
 0x2fd   :  { %376 = vsyncpa [#allocation3], 1 }
 0x2fe   :  { %377 = vsyncpa [#allocation6], 1 }
 0x2ff   :  { %378 = vsyncpa [#allocation9], 1 }
 0x300   :  { %379 = vsyncpa [#allocation4], 1 }

// kernel: tpu_custom_call.1
= control target key start
LH: loop header
LB: loop body
LE: loop exit
PB: predicated region body
PF: predicated region fallthrough
CT: control target
= control target key end

     0   :  { %12 = vsyncpa [#allocation3], 0  ;;  %s897_s0 = inlined_call_operand.hbm [shape: f32[8,128], index: 0, kind: input, shape index: {}]   ;;  %s898_s1 = inlined_call_operand.hbm [shape: f32[128,128], index: 1, kind: input, shape index: {}]   ;;  %s899_s2 = inlined_call_operand.vmem [shape: f32[1,128], index: 2, kind: input, shape index: {}]   ;;  %s900_s3 = inlined_call_operand.hbm [shape: f32[128,128], index: 3, kind: input, shape index: {}]   ;;  %s901_s4 = inlined_call_operand.vmem [shape: f32[1,128], index: 4, kind: input, shape index: {}]   ;;  %s902_s5 = inlined_call_operand.hbm [shape: f32[128,128], index: 5, kind: input, shape index: {}]   ;;  %s903_s6 = inlined_call_operand.vmem [shape: f32[1,128], index: 6, kind: input, shape index: {}]   ;;  %s904_s7 = inlined_call_operand.hbm [shape: f32[8,128], index: 7, kind: output, shape index: {}]  }
   0x1   :  { %13 = vsyncpa [#allocation6], 0 }
   0x2   :  { %14 = vsyncpa [#allocation9], 0 }
   0x3   :  { %15 = vsyncpa [#allocation4], 0  ;;  %s739_s24 = smov [#allocation5]   ;;  %s621_s28 = scalar_lea.hbm %s898_s1, 2048 }
   0x4   :  { %s31_s25 = sshll.u32 %s739_s24, 4  ;;  %p622_p0 = scmp.ne.s32.totalorder %s898_s1, %s621_s28  ;;  %s32_s25 = int_to_ptr.vmem [resolvable:$true] %s31_s25 }
   0x5   :  { %p625_p1 = scmp.lt.u32.totalorder %s621_s28, %s898_s1 }
   0x7   :  { %p627_p2 = pnand %p625_p1, %p622_p0 }
   0x9   :  { %630 = shalt.err (!%p627_p2)
}
   0xa   :  { %s631_s10 = scalar_lea.vmem %s32_s25, 2048  ;;  %p636_p4 = scmp.lt.s32.totalorder %s32_s25, %s32_s25 }
   0xb   :  { %p632_p3 = scmp.ne.s32.totalorder %s32_s25, %s631_s10  ;;  %p637_p5 = scmp.lt.s32.totalorder %s631_s10, %s631_s10 }
   0xd   :  { %p638_p6 = por %p637_p5, %p636_p4 }
   0xf   :  { %p639_p7 = pnand %p638_p6, %p632_p3 }
  0x11   :  { %642 = shalt.err (!%p639_p7)
}
  0x12   :  { %s740_s11 = smov 128   ;;  %s741_s12 = smov 8  }
  0x13   :  { %37 = dma.hbm_to_vmem [thread:$0]  %s898_s1, 2048, %s32_s25, [#allocation6], %s740_s11, %s740_s11, %s741_s12  }
  0x14   :  { %s742_s15 = smov [#allocation2]   ;;  %s743_s17 = smov [#allocation7]  }
  0x15   :  { %s22_s16 = sshll.u32 %s742_s15, 4  ;;  %s45_s18 = sshll.u32 %s743_s17, 4  ;;  %s23_s16 = int_to_ptr.vmem [resolvable:$true] %s22_s16  ;;  %s46_s18 = int_to_ptr.vmem [resolvable:$true] %s45_s18 }
  0x16   :  { %s643_s21 = scalar_lea.hbm %s897_s0, 128 }
  0x17   :  { %p644_p8 = scmp.ne.s32.totalorder %s897_s0, %s643_s21  ;;  %p647_p9 = scmp.lt.u32.totalorder %s643_s21, %s897_s0 }
  0x19   :  { %p649_p10 = pnand %p647_p9, %p644_p8 }
  0x1b   :  { %652 = shalt.err (!%p649_p10)
}
  0x1c   :  { %s653_s1 = scalar_lea.vmem %s23_s16, 128  ;;  %p658_p12 = scmp.lt.s32.totalorder %s23_s16, %s23_s16 }
  0x1d   :  { %p654_p11 = scmp.ne.s32.totalorder %s23_s16, %s653_s1  ;;  %p659_p13 = scmp.lt.s32.totalorder %s653_s1, %s653_s1 }
  0x1f   :  { %p660_p0 = por %p659_p13, %p658_p12 }
  0x21   :  { %p661_p1 = pnand %p660_p0, %p654_p11 }
  0x23   :  { %664 = shalt.err (!%p661_p1)
}
  0x24   :  { %25 = dma.hbm_to_vmem [thread:$0]  %s897_s0, 128, %s23_s16, [#allocation3]  }
  0x25   :  { %s665_s30 = scalar_lea.hbm %s900_s3, 2048 }
  0x26   :  { %p666_p2 = scmp.ne.s32.totalorder %s900_s3, %s665_s30  ;;  %p669_p3 = scmp.lt.u32.totalorder %s665_s30, %s900_s3 }
  0x28   :  { %p671_p4 = pnand %p669_p3, %p666_p2 }
  0x2a   :  { %674 = shalt.err (!%p671_p4)
}
  0x2b   :  { %s675_s14 = scalar_lea.vmem %s46_s18, 2048  ;;  %p680_p6 = scmp.lt.s32.totalorder %s46_s18, %s46_s18 }
  0x2c   :  { %p676_p5 = scmp.ne.s32.totalorder %s46_s18, %s675_s14  ;;  %p681_p7 = scmp.lt.s32.totalorder %s675_s14, %s675_s14 }
  0x2e   :  { %p682_p8 = por %p681_p7, %p680_p6 }
  0x30   :  { %p683_p9 = pnand %p682_p8, %p676_p5 }
  0x32   :  { %686 = shalt.err (!%p683_p9)
}
  0x33   :  { %51 = dma.hbm_to_vmem [thread:$0]  %s900_s3, 2048, %s46_s18, [#allocation6], %s740_s11, %s740_s11, %s741_s12  }
  0x34   :  { %s744_s16 = smov [#allocation8]   ;;  %s687_s21 = scalar_lea.hbm %s902_s5, 2048 }
  0x35   :  { %s59_s17 = sshll.u32 %s744_s16, 4  ;;  %p688_p10 = scmp.ne.s32.totalorder %s902_s5, %s687_s21  ;;  %s60_s17 = int_to_ptr.vmem [resolvable:$true] %s59_s17 }
  0x36   :  { %p691_p11 = scmp.lt.u32.totalorder %s687_s21, %s902_s5 }
  0x38   :  { %p693_p12 = pnand %p691_p11, %p688_p10 }
  0x3a   :  { %696 = shalt.err (!%p693_p12)
}
  0x3b   :  { %s697_s1 = scalar_lea.vmem %s60_s17, 2048  ;;  %p702_p0 = scmp.lt.s32.totalorder %s60_s17, %s60_s17 }
  0x3c   :  { %p698_p13 = scmp.ne.s32.totalorder %s60_s17, %s697_s1  ;;  %p703_p1 = scmp.lt.s32.totalorder %s697_s1, %s697_s1 }
  0x3e   :  { %p704_p2 = por %p703_p1, %p702_p0 }
  0x40   :  { %p705_p3 = pnand %p704_p2, %p698_p13 }
  0x42   :  { %708 = shalt.err (!%p705_p3)
}
  0x43   :  { %65 = dma.hbm_to_vmem [thread:$0]  %s902_s5, 2048, %s60_s17, [#allocation9], %s740_s11, %s740_s11, %s741_s12  }
  0x44   :  { %731 = dma.done.wait [#allocation3], 128  }
  0x45   :  { %732 = vsyncadd [#allocation3], 4294967168 }
  0x46   :  { %733 = dma.done.wait [#allocation6], 4096  }
  0x47   :  { %734 = vsyncadd [#allocation6], 4294963200 }
  0x48   :  { %735 = dma.done.wait [#allocation9], 2048  }
  0x49   :  { %736 = vsyncadd [#allocation9], 4294965248  ;;  %v745_v0 = vmov 0.0|0.0   ;;  %vm746_vm0 = vmmov 0   ;;  %v747_v1 = vmov 0.0   ;;  %v81_v2 = vld [vmem:[#allocation5] sm:$0xff] }
  0x4a   :  { %539 = vmatprep.subr.bf16.mxu0 %v745_v0  ;;  %466 = vmatprep.mubr.msk.f32.mxu0 %vm746_vm0, %v747_v1  ;;  %v82_v3 = vld [vmem:[#allocation5 + $0x8] sm:$0xff]  ;;  %v83_v4 = vld [vmem:[#allocation5 + $0x10] sm:$0xff]  ;;  %v84_v6 = vld [vmem:[#allocation5 + $0x18] sm:$0xff]  ;;  %s748_s28 = smov [#allocation10]  }
  0x4b   :  { %563 = vmatprep.subr.bf16.mxu1 %v745_v0  ;;  %501 = vmatprep.mubr.msk.f32.mxu1 %vm746_vm0, %v747_v1  ;;  %v540_v5 = vpack.c.bf16 %v82_v3, %v81_v2  ;;  %v543_v7 = vpack.c.bf16 %v84_v6, %v83_v4  ;;  %v85_v8 = vld [vmem:[#allocation5 + $0x20] sm:$0xff]  ;;  %v86_v9 = vld [vmem:[#allocation5 + $0x28] sm:$0xff]  ;;  %v177_v12 = vld [vmem:[#allocation7 + $0x10] sm:$0xff]  ;;  %s369_s29 = sshll.u32 %s748_s28, 4  ;;  %s370_s29 = int_to_ptr.vmem [resolvable:$true] %s369_s29 }
  0x4c   :  { %v175_v10 = vld [vmem:[#allocation7] sm:$0xff]  ;;  %v176_v11 = vld [vmem:[#allocation7 + $0x8] sm:$0xff]  ;;  %v178_v13 = vld [vmem:[#allocation7 + $0x18] sm:$0xff]  ;;  %v546_v14 = vpack.c.bf16 %v86_v9, %v85_v8  ;;  %s709_s30 = scalar_lea.vmem %s370_s29, 128  ;;  %p714_p5 = scmp.lt.s32.totalorder %s370_s29, %s370_s29 }
  0x4d   :  { %541 = vmatpush3.bf16.msra.mxu0 %v540_v5  ;;  %v564_v15 = vpack.c.bf16 %v176_v11, %v175_v10  ;;  %v87_v16 = vld [vmem:[#allocation5 + $0x30] sm:$0xff]  ;;  %v88_v17 = vld [vmem:[#allocation5 + $0x38] sm:$0xff]  ;;  %v567_v18 = vpack.c.bf16 %v178_v13, %v177_v12  ;;  %v179_v19 = vld [vmem:[#allocation7 + $0x20] sm:$0xff]  ;;  %p710_p4 = scmp.ne.s32.totalorder %s370_s29, %s709_s30  ;;  %p715_p6 = scmp.lt.s32.totalorder %s709_s30, %s709_s30 }
  0x4e   :  { %542 = vmatprep.subr.bf16.mxu0 %v745_v0  ;;  %v180_v20 = vld [vmem:[#allocation7 + $0x28] sm:$0xff]  ;;  %v549_v21 = vpack.c.bf16 %v88_v17, %v87_v16  ;;  %v89_v22 = vld [vmem:[#allocation5 + $0x40] sm:$0xff]  ;;  %v181_v25 = vld [vmem:[#allocation7 + $0x30] sm:$0xff] }
  0x4f   :  { %565 = vmatpush3.bf16.msra.mxu1 %v564_v15  ;;  %v90_v23 = vld [vmem:[#allocation5 + $0x48] sm:$0xff]  ;;  %v570_v24 = vpack.c.bf16 %v180_v20, %v179_v19  ;;  %v182_v26 = vld [vmem:[#allocation7 + $0x38] sm:$0xff]  ;;  %v91_v28 = vld [vmem:[#allocation5 + $0x50] sm:$0xff]  ;;  %p716_p7 = por %p715_p6, %p714_p5 }
  0x50   :  { %566 = vmatprep.subr.bf16.mxu1 %v745_v0  ;;  %v552_v27 = vpack.c.bf16 %v90_v23, %v89_v22  ;;  %v92_v29 = vld [vmem:[#allocation5 + $0x58] sm:$0xff]  ;;  %v573_v30 = vpack.c.bf16 %v182_v26, %v181_v25  ;;  %v183_v31 = vld [vmem:[#allocation7 + $0x40] sm:$0xff]  ;;  %v184_v32 = vld [vmem:[#allocation7 + $0x48] sm:$0xff] }
  0x51   :  { %544 = vmatpush3.bf16.msra.mxu0 %v543_v7  ;;  %v555_v33 = vpack.c.bf16 %v92_v29, %v91_v28  ;;  %v93_v34 = vld [vmem:[#allocation5 + $0x60] sm:$0xff]  ;;  %v94_v35 = vld [vmem:[#allocation5 + $0x68] sm:$0xff]  ;;  %v576_v36 = vpack.c.bf16 %v184_v32, %v183_v31  ;;  %v185_v37 = vld [vmem:[#allocation7 + $0x50] sm:$0xff]  ;;  %p717_p8 = pnand %p716_p7, %p710_p4 }
  0x52   :  { %545 = vmatprep.subr.bf16.mxu0 %v745_v0  ;;  %v186_v38 = vld [vmem:[#allocation7 + $0x58] sm:$0xff]  ;;  %v558_v39 = vpack.c.bf16 %v94_v35, %v93_v34  ;;  %v95_v40 = vld [vmem:[#allocation5 + $0x70] sm:$0xff]  ;;  %v187_v43 = vld [vmem:[#allocation7 + $0x60] sm:$0xff] }
  0x53   :  { %568 = vmatpush3.bf16.msra.mxu1 %v567_v18  ;;  %v96_v41 = vld [vmem:[#allocation5 + $0x78] sm:$0xff]  ;;  %v579_v42 = vpack.c.bf16 %v186_v38, %v185_v37  ;;  %v188_v44 = vld [vmem:[#allocation7 + $0x68] sm:$0xff]  ;;  %v189_v48 = vld [vmem:[#allocation7 + $0x70] sm:$0xff] }
  0x54   :  { %569 = vmatprep.subr.bf16.mxu1 %v745_v0  ;;  %v561_v45 = vpack.c.bf16 %v96_v41, %v95_v40  ;;  %v582_v46 = vpack.c.bf16 %v188_v44, %v187_v43  ;;  %v80_v47 = vld [vmem:[#allocation2] sm:$0xff]  ;;  %v269_v51 = vld [vmem:[#allocation8] sm:$0xff]  ;;  %v270_v52 = vld [vmem:[#allocation8 + $0x8] sm:$0xff] }
  0x55   :  { %547 = vmatpush3.bf16.msra.mxu0 %v546_v14  ;;  %v190_v49 = vld [vmem:[#allocation7 + $0x78] sm:$0xff]  ;;  %v271_v53 = vld [vmem:[#allocation8 + $0x10] sm:$0xff]  ;;  %v588_v54 = vpack.c.bf16 %v270_v52, %v269_v51  ;;  %v273_v57 = vld [vmem:[#allocation8 + $0x20] sm:$0xff] }
  0x56   :  { %548 = vmatprep.subr.bf16.mxu0 %v745_v0  ;;  %v585_v50 = vpack.c.bf16 %v190_v49, %v189_v48  ;;  %v272_v55 = vld [vmem:[#allocation8 + $0x18] sm:$0xff]  ;;  %v274_v58 = vld [vmem:[#allocation8 + $0x28] sm:$0xff]  ;;  %v275_v60 = vld [vmem:[#allocation8 + $0x30] sm:$0xff] }
  0x57   :  { %571 = vmatpush3.bf16.msra.mxu1 %v570_v24  ;;  %v591_v56 = vpack.c.bf16 %v272_v55, %v271_v53  ;;  %v594_v59 = vpack.c.bf16 %v274_v58, %v273_v57  ;;  %v276_v61 = vld [vmem:[#allocation8 + $0x38] sm:$0xff]  ;;  %v277_v63 = vld [vmem:[#allocation8 + $0x40] sm:$0xff]  ;;  %v279_v3 = vld [vmem:[#allocation8 + $0x50] sm:$0xff] }
  0x58   :  { %572 = vmatprep.subr.bf16.mxu1 %v745_v0  ;;  %v597_v62 = vpack.c.bf16 %v276_v61, %v275_v60  ;;  %v280_v4 = vld [vmem:[#allocation8 + $0x58] sm:$0xff]  ;;  %v281_v6 = vld [vmem:[#allocation8 + $0x60] sm:$0xff]  ;;  %v282_v7 = vld [vmem:[#allocation8 + $0x68] sm:$0xff] }
  0x59   :  { %550 = vmatpush3.bf16.msra.mxu0 %v549_v21  ;;  %v603_v5 = vpack.c.bf16 %v280_v4, %v279_v3  ;;  %v606_v8 = vpack.c.bf16 %v282_v7, %v281_v6  ;;  %v380_v9 = vld [vmem:[%s899_s2] ss:$0 sm:$0xff]  ;;  %v283_v14 = vld [vmem:[#allocation8 + $0x70] sm:$0xff] }
  0x5a   :  { %551 = vmatprep.subr.bf16.mxu0 %v745_v0  ;;  %v284_v15 = vld [vmem:[#allocation8 + $0x78] sm:$0xff] }
  0x5b   :  { %574 = vmatpush3.bf16.msra.mxu1 %v573_v30  ;;  %v609_v16 = vpack.c.bf16 %v284_v15, %v283_v14  ;;  %v381_v17 = vld [vmem:[%s901_s4] ss:$0 sm:$0xff] }
  0x5c   :  { %575 = vmatprep.subr.bf16.mxu1 %v745_v0  ;;  %v382_v21 = vld [vmem:[%s903_s6] ss:$0 sm:$0xff] }
  0x5d   :  { %553 = vmatpush3.bf16.msra.mxu0 %v552_v27 }
  0x5e   :  { %554 = vmatprep.subr.bf16.mxu0 %v745_v0 }
  0x5f   :  { %577 = vmatpush3.bf16.msra.mxu1 %v576_v36 }
  0x60   :  { %578 = vmatprep.subr.bf16.mxu1 %v745_v0 }
  0x61   :  { %556 = vmatpush3.bf16.msra.mxu0 %v555_v33 }
  0x62   :  { %557 = vmatprep.subr.bf16.mxu0 %v745_v0 }
  0x63   :  { %580 = vmatpush3.bf16.msra.mxu1 %v579_v42 }
  0x64   :  { %581 = vmatprep.subr.bf16.mxu1 %v745_v0 }
  0x65   :  { %559 = vmatpush3.bf16.msra.mxu0 %v558_v39 }
  0x66   :  { %560 = vmatprep.subr.bf16.mxu0 %v745_v0 }
  0x67   :  { %583 = vmatpush3.bf16.msra.mxu1 %v582_v46 }
  0x68   :  { %584 = vmatprep.subr.bf16.mxu1 %v745_v0 }
  0x69   :  { %562 = vmatpush3.bf16.msra.mxu0 %v561_v45 }
  0x6a   :  { %587 = vmatprep.subr.bf16.mxu0 %v745_v0 }
  0x6b   :  { %586 = vmatpush3.bf16.msra.mxu1 %v585_v50 }
  0x6c   :  { %467 = vmatmul.mubr.f32.vlgmr.msra.gmra.mrb[0].mxu0 %v80_v47 }
  0x6d   :  { %536 = vmatprep.mubr.msk.f32.mxu0 %vm746_vm0, %v747_v1  ;;  %589 = vmatpush3.bf16.msra.mxu0 %v588_v54  ;;  %v278_v1 = vld [vmem:[#allocation8 + $0x48] sm:$0xff] }
  0x6e   :  { %590 = vmatprep.subr.bf16.mxu0 %v745_v0  ;;  %v600_v2 = vpack.c.bf16 %v278_v1, %v277_v63 }
  0x71   :  { %592 = vmatpush3.bf16.msra.mxu0 %v591_v56 }
  0x72   :  { %593 = vmatprep.subr.bf16.mxu0 %v745_v0 }
  0x75   :  { %595 = vmatpush3.bf16.msra.mxu0 %v594_v59 }
  0x76   :  { %596 = vmatprep.subr.bf16.mxu0 %v745_v0 }
  0x79   :  { %598 = vmatpush3.bf16.msra.mxu0 %v597_v62 }
  0x7a   :  { %599 = vmatprep.subr.bf16.mxu0 %v745_v0 }
  0x7d   :  { %601 = vmatpush3.bf16.msra.mxu0 %v600_v2 }
  0x7e   :  { %602 = vmatprep.subr.bf16.mxu0 %v745_v0 }
  0x81   :  { %604 = vmatpush3.bf16.msra.mxu0 %v603_v5 }
  0x82   :  { %605 = vmatprep.subr.bf16.mxu0 %v745_v0 }
  0x85   :  { %607 = vmatpush3.bf16.msra.mxu0 %v606_v8 }
  0x86   :  { %608 = vmatprep.subr.bf16.mxu0 %v745_v0 }
  0x89   :  { %610 = vmatpush3.bf16.msra.mxu0 %v609_v16 }
 0x13f   :  { %v170_v10 = vpop.f32.mrb[0].mxu0 }
 0x140   :  { %v171_v11 = vadd.f32 %v380_v9, %v170_v10  ;;  %v468_v12 = vpop.f32.mrb[1].mxu0 }
 0x142   :  { %v174_v13 = vmax.f32 %v171_v11, 0.0 }
 0x144   :  { %502 = vmatmul.mubr.f32.vlgmr.msra.gmra.mrb[0].mxu1 %v174_v13 }
 0x217   :  { %v264_v18 = vpop.f32.mrb[0].mxu1 }
 0x218   :  { %v265_v19 = vadd.f32 %v381_v17, %v264_v18  ;;  %v503_v0 = vpop.f32.mrb[1].mxu1 }
 0x21a   :  { %v268_v20 = vmax.f32 %v265_v19, 0.0 }
 0x21c   :  { %537 = vmatmul.mubr.f32.vlgmr.msra.gmra.mrb[2].mxu0 %v268_v20 }
 0x2ef   :  { %v358_v22 = vpop.f32.mrb[2].mxu0 }
 0x2f0   :  { %v359_v23 = vadd.f32 %v382_v21, %v358_v22  ;;  %v538_v24 = vpop.f32.mrb[3].mxu0 }
 0x2f2   :  { %362 = vst [vmem:[#allocation10] sm:$0xff] %v359_v23 }
 0x2f3   :  { %720 = shalt.err (!%p717_p8)
}
 0x2f4   :  { %s721_s9 = scalar_lea.hbm %s904_s7, 128 }
 0x2f5   :  { %p722_p9 = scmp.ne.s32.totalorder %s904_s7, %s721_s9  ;;  %p725_p10 = scmp.lt.u32.totalorder %s721_s9, %s904_s7 }
 0x2f7   :  { %p727_p11 = pnand %p725_p10, %p722_p9 }
 0x2f9   :  { %730 = shalt.err (!%p727_p11)
}
 0x2fa   :  { %372 = dma.vmem_to_hbm [thread:$0]  %s370_s29, 128, %s904_s7, [#allocation4]  }
 0x2fb   :  { %737 = dma.done.wait [#allocation4], 128  }
 0x2fc   :  { %738 = vsyncadd [#allocation4], 4294967168 }
 0x2fd   :  { %376 = vsyncpa [#allocation3], 1 }
 0x2fe   :  { %377 = vsyncpa [#allocation6], 1 }
 0x2ff   :  { %378 = vsyncpa [#allocation9], 1 }
 0x300   :  { %379 = vsyncpa [#allocation4], 1 }

</bundles_post_ra>
